<compile_context>
chip_gen: v7x
topology: tpu7x:2x2x1
jax: 0.10.0
libtpu: 0.0.40
codegen_flags: <defaults>
</compile_context>

<pallas_src>
import math

import jax
import jax.numpy as jnp
from jax.experimental import pallas as pl
from jax.experimental.pallas import tpu as pltpu


def gate_attention_kernel(x_ref, w_ref, c_ref, wg_ref, bg_ref, o_ref):
    bt, s, f = x_ref.shape  # (Bt, S, F) block
    xb = x_ref[...]                                   # native dtype, (Bt, S, F)
    x2d = xb.reshape(bt * s, f)                       # collapse leading dims (minor dim untouched)

    # scores = tanh(x @ attention_weights)            -> (Bt*S, A), one big-M MXU pass
    scores = jnp.tanh(
        jnp.dot(x2d, w_ref[...], preferred_element_type=jnp.float32)
    )

    # attention logits = scores @ context_vector done as VPU mul + lane reduce
    # (avoids an N=1 MXU matmul / full MXU drain for a single column).
    logits = jnp.sum(scores * c_ref[...].astype(jnp.float32),
                     axis=-1, keepdims=True)          # (Bt*S, 1)
    logits = logits.reshape(bt, s, 1)                 # split leading dim only

    # softmax over the sequence axis (PyTorch dim=1), independently per batch.
    # Logits occupy <= a couple of vregs, so the sublane-axis reduce here is
    # negligible; a lane-major relayout would cost as much as it saves.
    m = jnp.max(logits, axis=1, keepdims=True)
    e = jnp.exp(logits - m)
    att = e / jnp.sum(e, axis=1, keepdims=True)       # (Bt, S, 1), f32

    # gated_scores = sigmoid(Linear(x)) = sigmoid(x @ Wg^T + b)  -> (Bt*S, F)
    gate = jax.nn.sigmoid(
        jnp.dot(x2d, wg_ref[...], preferred_element_type=jnp.float32)
        + bg_ref[...].astype(jnp.float32)
    )

    # attended = attention_scores * gated_scores * x, all in f32; single cast at store.
    attended = att * gate.reshape(bt, s, f) * xb.astype(jnp.float32)
    o_ref[...] = attended.astype(o_ref.dtype)


def _pick_batch_tile(B, S, target_rows=512):
    """Largest divisor of B whose tile has at most ~target_rows (Bt*S) matmul rows."""
    bt = 1
    for d in range(1, B + 1):
        if B % d == 0 and d * S <= target_rows:
            bt = d
    return bt


def gate_attention(x, attention_weights, context_vector, gate_weight, gate_bias,
                   *, batch_tile=None):
    """x: (B, S, F); attention_weights: (F, A); context_vector: (A, 1);
    gate_weight: (F_out, F_in) in nn.Linear convention; gate_bias: (F,)."""
    B, S, F = x.shape
    Fw, A = attention_weights.shape
    assert Fw == F

    bt = batch_tile if batch_tile is not None else _pick_batch_tile(B, S)
    assert B % bt == 0
    n_steps = B // bt

    # NOTE: if gate_weight is a static parameter, pre-transpose it once outside
    # the jitted path; here it is done per call for self-containment.
    wg_t = gate_weight.T                  # (F_in, F_out) so kernel does x @ wg_t
    c_row = context_vector.reshape(1, A)  # (1, A) row for the lane-reduce path
    bg = gate_bias.reshape(1, F)          # (1, F) for 2D broadcast in VMEM

    # --- VMEM budget: double-buffered x/out tiles + resident weights (+ slack). ---
    x_item = jnp.dtype(x.dtype).itemsize
    block_bytes = bt * S * F * x_item
    param_bytes = (
        attention_weights.size * jnp.dtype(attention_weights.dtype).itemsize
        + c_row.size * jnp.dtype(c_row.dtype).itemsize
        + wg_t.size * jnp.dtype(wg_t.dtype).itemsize
        + bg.size * jnp.dtype(bg.dtype).itemsize
    )
    needed = 2 * (2 * block_bytes) + 2 * param_bytes + (4 << 20)
    vmem_limit = int(min(64 * 1024 * 1024, max(32 * 1024 * 1024, 2 * needed)))

    # --- Advisory cost estimate so XLA schedules surrounding ops sensibly. ---
    flops = 2 * B * S * F * A + 2 * B * S * A + 2 * B * S * F * F + 4 * B * S * F
    transcendentals = B * S * (A + F + 1)            # tanh + sigmoid + exp
    bytes_accessed = 2 * B * S * F * x_item + param_bytes
    cost = pl.CostEstimate(flops=int(flops),
                           transcendentals=int(transcendentals),
                           bytes_accessed=int(bytes_accessed))

    return pl.pallas_call(
        gate_attention_kernel,
        out_shape=jax.ShapeDtypeStruct((B, S, F), x.dtype),
        grid_spec=pltpu.PrefetchScalarGridSpec(
            num_scalar_prefetch=0,
            grid=(n_steps,),
            in_specs=[
                pl.BlockSpec((bt, S, F), lambda i: (i, 0, 0)),  # x: Bt batches per step
                pl.BlockSpec((F, A), lambda i: (0, 0)),         # attention_weights (resident)
                pl.BlockSpec((1, A), lambda i: (0, 0)),         # context vector row
                pl.BlockSpec((F, F), lambda i: (0, 0)),         # gate weight (pre-transposed)
                pl.BlockSpec((1, F), lambda i: (0, 0)),         # gate bias
            ],
            out_specs=pl.BlockSpec((bt, S, F), lambda i: (i, 0, 0)),
        ),
        compiler_params=pltpu.CompilerParams(
            dimension_semantics=("parallel",),
            vmem_limit_bytes=vmem_limit,
        ),
        cost_estimate=cost,
    )(x, attention_weights, c_row, wg_t, bg)


def gate_attention_ref(x, attention_weights, context_vector, gate_weight, gate_bias):
    scores = jnp.tanh(x @ attention_weights)
    att = scores @ context_vector
    att = jax.nn.softmax(att, axis=1)
    gate = jax.nn.sigmoid(x @ gate_weight.T + gate_bias)
    return att * gate * x


if __name__ == "__main__":
    # Small shapes consistent with the module's forward.
    B, S, F, A = 2, 8, 32, 16

    key = jax.random.PRNGKey(0)
    k_x, k_w, k_c, k_gw, k_gb = jax.random.split(key, 5)

    x = jax.random.normal(k_x, (B, S, F), dtype=jnp.float32)

    # Deterministic kaiming-uniform-like init (a=sqrt(5)) for the parameters.
    bound_w = math.sqrt(6.0 / ((1.0 + 5.0) * F))
    attention_weights = jax.random.uniform(
        k_w, (F, A), minval=-bound_w, maxval=bound_w, dtype=jnp.float32)
    bound_c = math.sqrt(6.0 / ((1.0 + 5.0) * A))
    context_vector = jax.random.uniform(
        k_c, (A, 1), minval=-bound_c, maxval=bound_c, dtype=jnp.float32)

    # nn.Linear(F, F) default init
    bound_g = 1.0 / math.sqrt(F)
    gate_weight = jax.random.uniform(
        k_gw, (F, F), minval=-bound_g, maxval=bound_g, dtype=jnp.float32)
    gate_bias = jax.random.uniform(
        k_gb, (F,), minval=-bound_g, maxval=bound_g, dtype=jnp.float32)

    out = gate_attention(x, attention_weights, context_vector, gate_weight, gate_bias)
    out = jax.block_until_ready(out)

    ref = gate_attention_ref(x, attention_weights, context_vector, gate_weight, gate_bias)
    assert out.shape == (B, S, F)
    assert jnp.allclose(out, ref, atol=1e-5, rtol=1e-5)

    print("KERNEL_OK")
</pallas_src>

<mosaic_0001>
module attributes {stable_mosaic.version = 11 : i64} {
  func.func @gate_attention_kernel(%arg0: i32, %arg1: memref<2x8x32xf32, #tpu.memory_space<vmem>>, %arg2: memref<32x16xf32, #tpu.memory_space<vmem>>, %arg3: memref<1x16xf32, #tpu.memory_space<vmem>>, %arg4: memref<32x32xf32, #tpu.memory_space<vmem>>, %arg5: memref<1x32xf32, #tpu.memory_space<vmem>>, %arg6: memref<2x8x32xf32, #tpu.memory_space<vmem>>) attributes {dimension_semantics = [#tpu.dimension_semantics<parallel>], iteration_bounds = array<i64: 1>, scalar_prefetch = 0 : i64, scratch_operands = 0 : i64, tpu.core_type = #tpu.core_type<tc>, window_params = [{transform_indices = @transform_0, window_bounds = array<i64: 2, 8, 32>}, {pipeline_mode = #tpu.pipeline_mode<synchronous>, transform_indices = @transform_1, window_bounds = array<i64: 32, 16>}, {pipeline_mode = #tpu.pipeline_mode<synchronous>, transform_indices = @transform_2, window_bounds = array<i64: 1, 16>}, {pipeline_mode = #tpu.pipeline_mode<synchronous>, transform_indices = @transform_3, window_bounds = array<i64: 32, 32>}, {pipeline_mode = #tpu.pipeline_mode<synchronous>, transform_indices = @transform_4, window_bounds = array<i64: 1, 32>}, {transform_indices = @transform_5, window_bounds = array<i64: 2, 8, 32>}]} {
    %c0 = arith.constant 0 : index
    %c0_0 = arith.constant 0 : index
    %c0_1 = arith.constant 0 : index
    %0 = vector.load %arg1[%c0, %c0_0, %c0_1] : memref<2x8x32xf32, #tpu.memory_space<vmem>>, vector<2x8x32xf32>
    %1 = vector.shape_cast %0 : vector<2x8x32xf32> to vector<16x32xf32>
    %c0_2 = arith.constant 0 : index
    %c0_3 = arith.constant 0 : index
    %2 = vector.load %arg2[%c0_2, %c0_3] : memref<32x16xf32, #tpu.memory_space<vmem>>, vector<32x16xf32>
    %cst = arith.constant dense<0.000000e+00> : vector<16x16xf32>
    %3 = tpu.matmul %1, %2, %cst {dimension_numbers = #tpu.dot_dimension_numbers<[1], [0], [0], [1], [0, 0, 1, 1], [], []>} : vector<16x32xf32>, vector<32x16xf32>, vector<16x16xf32> -> vector<16x16xf32>
    %4 = math.tanh %3 : vector<16x16xf32>
    %c0_4 = arith.constant 0 : index
    %c0_5 = arith.constant 0 : index
    %5 = vector.load %arg3[%c0_4, %c0_5] : memref<1x16xf32, #tpu.memory_space<vmem>>, vector<1x16xf32>
    %6 = vector.broadcast %5 : vector<1x16xf32> to vector<16x16xf32>
    %7 = arith.mulf %4, %6 : vector<16x16xf32>
    %cst_6 = arith.constant dense<0.000000e+00> : vector<16xf32>
    %8 = vector.multi_reduction <add>, %7, %cst_6 [1] : vector<16x16xf32> to vector<16xf32>
    %9 = vector.shape_cast %8 : vector<16xf32> to vector<16x1xf32>
    %10 = vector.shape_cast %9 : vector<16x1xf32> to vector<2x8x1xf32>
    %cst_7 = arith.constant dense<0xFF800000> : vector<2x1xf32>
    %11 = vector.multi_reduction <maximumf>, %10, %cst_7 [1] : vector<2x8x1xf32> to vector<2x1xf32>
    %12 = vector.shape_cast %11 : vector<2x1xf32> to vector<2x1x1xf32>
    %13 = vector.broadcast %12 : vector<2x1x1xf32> to vector<2x8x1xf32>
    %14 = arith.subf %10, %13 : vector<2x8x1xf32>
    %15 = math.exp %14 : vector<2x8x1xf32>
    %cst_8 = arith.constant dense<0.000000e+00> : vector<2x1xf32>
    %16 = vector.multi_reduction <add>, %15, %cst_8 [1] : vector<2x8x1xf32> to vector<2x1xf32>
    %17 = vector.shape_cast %16 : vector<2x1xf32> to vector<2x1x1xf32>
    %18 = vector.broadcast %17 : vector<2x1x1xf32> to vector<2x8x1xf32>
    %19 = arith.divf %15, %18 : vector<2x8x1xf32>
    %c0_9 = arith.constant 0 : index
    %c0_10 = arith.constant 0 : index
    %20 = vector.load %arg4[%c0_9, %c0_10] : memref<32x32xf32, #tpu.memory_space<vmem>>, vector<32x32xf32>
    %cst_11 = arith.constant dense<0.000000e+00> : vector<16x32xf32>
    %21 = tpu.matmul %1, %20, %cst_11 {dimension_numbers = #tpu.dot_dimension_numbers<[1], [0], [0], [1], [0, 0, 1, 1], [], []>} : vector<16x32xf32>, vector<32x32xf32>, vector<16x32xf32> -> vector<16x32xf32>
    %c0_12 = arith.constant 0 : index
    %c0_13 = arith.constant 0 : index
    %22 = vector.load %arg5[%c0_12, %c0_13] : memref<1x32xf32, #tpu.memory_space<vmem>>, vector<1x32xf32>
    %23 = vector.broadcast %22 : vector<1x32xf32> to vector<16x32xf32>
    %24 = arith.addf %21, %23 : vector<16x32xf32>
    %25 = arith.negf %24 : vector<16x32xf32>
    %26 = math.exp %25 : vector<16x32xf32>
    %cst_14 = arith.constant 1.000000e+00 : f32
    %27 = vector.broadcast %cst_14 : f32 to vector<16x32xf32>
    %28 = arith.addf %27, %26 : vector<16x32xf32>
    %29 = arith.divf %27, %28 : vector<16x32xf32>
    %30 = vector.shape_cast %29 : vector<16x32xf32> to vector<2x8x32xf32>
    %31 = vector.broadcast %19 : vector<2x8x1xf32> to vector<2x8x32xf32>
    %32 = arith.mulf %31, %30 : vector<2x8x32xf32>
    %33 = arith.mulf %32, %0 : vector<2x8x32xf32>
    %c0_15 = arith.constant 0 : index
    %c0_16 = arith.constant 0 : index
    %c0_17 = arith.constant 0 : index
    %34 = vector.load %arg6[%c0_15, %c0_16, %c0_17] : memref<2x8x32xf32, #tpu.memory_space<vmem>>, vector<2x8x32xf32>
    tpu.vector_store %arg6[%c0_15, %c0_16, %c0_17], %33 {strides = array<i32>} : memref<2x8x32xf32, #tpu.memory_space<vmem>>, vector<2x8x32xf32>,
    return
  }
  func.func @transform_0(%arg0: i32) -> (i32, i32, i32) {
    %c0_i32 = arith.constant 0 : i32
    %c0_i32_0 = arith.constant 0 : i32
    %c0_i32_1 = arith.constant 0 : i32
    return %arg0, %c0_i32, %c0_i32_0 : i32, i32, i32
  }
  func.func @transform_1(%arg0: i32) -> (i32, i32) {
    %c0_i32 = arith.constant 0 : i32
    %c0_i32_0 = arith.constant 0 : i32
    %c0_i32_1 = arith.constant 0 : i32
    return %c0_i32, %c0_i32_0 : i32, i32
  }
  func.func @transform_2(%arg0: i32) -> (i32, i32) {
    %c0_i32 = arith.constant 0 : i32
    %c0_i32_0 = arith.constant 0 : i32
    %c0_i32_1 = arith.constant 0 : i32
    return %c0_i32, %c0_i32_0 : i32, i32
  }
  func.func @transform_3(%arg0: i32) -> (i32, i32) {
    %c0_i32 = arith.constant 0 : i32
    %c0_i32_0 = arith.constant 0 : i32
    %c0_i32_1 = arith.constant 0 : i32
    return %c0_i32, %c0_i32_0 : i32, i32
  }
  func.func @transform_4(%arg0: i32) -> (i32, i32) {
    %c0_i32 = arith.constant 0 : i32
    %c0_i32_0 = arith.constant 0 : i32
    %c0_i32_1 = arith.constant 0 : i32
    return %c0_i32, %c0_i32_0 : i32, i32
  }
  func.func @transform_5(%arg0: i32) -> (i32, i32, i32) {
    %c0_i32 = arith.constant 0 : i32
    %c0_i32_0 = arith.constant 0 : i32
    %c0_i32_1 = arith.constant 0 : i32
    return %arg0, %c0_i32, %c0_i32_0 : i32, i32, i32
  }
}

</mosaic_0001>

<bundles_post_ra>
// kernel: tpu_custom_call.1
= control target key start
LH: loop header
LB: loop body
LE: loop exit
PB: predicated region body
PF: predicated region fallthrough
CT: control target
= control target key end

     0   :  { %vm27_vm0 = vcmask 261120   ;;  %s483_s0 = inlined_call_operand.vmem [shape: f32[2,8,32], index: 0, kind: input, shape index: {}]   ;;  %s484_s1 = inlined_call_operand.vmem [shape: f32[32,16], index: 1, kind: input, shape index: {}]   ;;  %s485_s2 = inlined_call_operand.vmem [shape: f32[1,16], index: 2, kind: input, shape index: {}]   ;;  %s486_s3 = inlined_call_operand.vmem [shape: f32[32,32], index: 3, kind: input, shape index: {}]   ;;  %s487_s4 = inlined_call_operand.vmem [shape: f32[1,32], index: 4, kind: input, shape index: {}]   ;;  %s488_s5 = inlined_call_operand.hbm [shape: f32[2,8,32], index: 5, kind: output, shape index: {}]  }
   0x1   :  { %v23_v0 = vld [vmem:[%s484_s1] sm:$0xff]  ;;  %v24_v1 = vld [vmem:[%s484_s1 + $0x8] sm:$0xff]  ;;  %v25_v2 = vld [vmem:[%s484_s1 + $0x10] sm:$0xff] }
   0x2   :  { %v323_v3 = vpack.c.bf16 %v24_v1, %v23_v0  ;;  %v26_v4 = vld [vmem:[%s484_s1 + $0x18] sm:$0xff]  ;;  %v434_v5 = vld [vmem:[%s483_s0] sm:$0xff]  ;;  %v162_v8 = vld [vmem:[%s486_s3 + $0x8] sm:$0xff] }
   0x3   :  { %v327_v6 = vpack.c.bf16 %v26_v4, %v25_v2  ;;  %309 = vmatprep.mubr.msk.f32.mxu0 %vm27_vm0, %v434_v5  ;;  %v161_v7 = vld [vmem:[%s486_s3] sm:$0xff]  ;;  %v163_v9 = vld [vmem:[%s486_s3 + $0x10] sm:$0xff]  ;;  %320 = vmatprep.mubr.msk.f32.mxu1 %vm27_vm0, %v434_v5  ;;  %v164_v11 = vld [vmem:[%s486_s3 + $0x18] sm:$0xff] }
   0x4   :  { %324 = vmatprep.subr.bf16.mxu0 %v323_v3  ;;  %v331_v10 = vpack.c.bf16 %v162_v8, %v161_v7 }
   0x5   :  { %10 = vsyncpa [#allocation3], 0  ;;  %326 = vmatpush3.bf16.msra.mxu0 %v323_v3  ;;  %v335_v12 = vpack.c.bf16 %v164_v11, %v163_v9  ;;  %v455_v13 = vld [vmem:[%s483_s0 + $0x8] sm:$0xff]  ;;  %v283_v16 = vld [vmem:[%s485_s2] ss:$0 sm:$0xff]  ;;  %vm120_vm1 = vcmask 130048  }
   0x6   :  { %328 = vmatprep.subr.bf16.mxu0 %v327_v6  ;;  %332 = vmatprep.subr.bf16.mxu1 %v331_v10  ;;  %v284_v37 = vld [vmem:[%s487_s4] ss:$0 sm:$0xff]  ;;  %s386_s4 = smov [#allocation2]  }
   0x7   :  { %334 = vmatpush3.bf16.msra.mxu1 %v331_v10  ;;  %s270_s13 = sshll.u32 %s386_s4, 4  ;;  %s271_s13 = int_to_ptr.vmem [resolvable:$true] %s270_s13 }
   0x8   :  { %336 = vmatprep.subr.bf16.mxu1 %v335_v12  ;;  %s362_s14 = scalar_lea.vmem %s271_s13, 256  ;;  %p367_p1 = scmp.lt.s32.totalorder %s271_s13, %s271_s13 }
   0x9   :  { %330 = vmatpush3.bf16.msra.mxu0 %v327_v6  ;;  %p363_p0 = scmp.ne.s32.totalorder %s271_s13, %s362_s14  ;;  %p368_p2 = scmp.lt.s32.totalorder %s362_s14, %s362_s14 }
   0xb   :  { %338 = vmatpush3.bf16.msra.mxu1 %v335_v12  ;;  %p369_p3 = por %p368_p2, %p367_p1 }
   0xc   :  { %310 = vmatmul.mubr.msk.f32.vlgmr.msra.gmra.mrb[0].mxu0 %vm27_vm0, %v455_v13 }
   0xd   :  { %p370_p4 = pnand %p369_p3, %p363_p0 }
   0xe   :  { %321 = vmatmul.mubr.msk.f32.vlgmr.msra.gmra.mrb[0].mxu1 %vm27_vm0, %v455_v13 }
  0xdf   :  { %v311_v14 = vpop.f32.mrb[0].mxu0 }
  0xe0   :  { %342 = vtanh.f32 %v311_v14  ;;  %v100_v15 = vpop.f32.mrb[1].mxu0 }
  0xe1   :  { %344 = vtanh.f32 %v100_v15  ;;  %v322_v23 = vpop.f32.mrb[0].mxu1 }
  0xe2   :  { %v238_v24 = vpop.f32.mrb[1].mxu1  ;;  %v244_v44 = vadd.f32 %v322_v23, %v284_v37 }
  0xe3   :  { %v239_v40 = vadd.f32 %v284_v37, %v238_v24 }
  0xe4   :  { %v288_v47 = vmul.f32 -1.442695, %v244_v44 }
  0xe5   :  { %v287_v45 = vmul.f32 -1.442695, %v239_v40 }
  0xea   :  { %v343_v17 = vpop.eup %342 }
  0xeb   :  { %v345_v18 = vpop.eup %344  ;;  %v119_v21 = vmul.f32 %v343_v17, %v283_v16 }
  0xec   :  { %v118_v19 = vmul.f32 %v345_v18, %v283_v16 }
  0xed   :  { %v124_v22 = vsel %vm120_vm1, %v119_v21, 0.0 }
  0xee   :  { %v121_v20 = vsel %vm120_vm1, %v118_v19, 0.0 }
  0xef   :  { %122 = vadd.xlane.f32.xlu0 %v121_v20 }
  0xf3   :  { %125 = vadd.xlane.f32.xlu0 %v124_v22 }
 0x17c   :  { %v123_v25 = vpop.xlane.xlu0 %122 }
 0x17d   :  { %v127_v26 = vrot.slane %v123_v25, 4 }
 0x17f   :  { %v128_v27 = vmax.f32 %v123_v25, %v127_v26 }
 0x180   :  { %v126_v28 = vpop.xlane.xlu0 %125 }
 0x181   :  { %v129_v29 = vrot.slane %v128_v27, 2  ;;  %v133_v30 = vrot.slane %v126_v28, 4 }
 0x183   :  { %v130_v31 = vmax.f32 %v128_v27, %v129_v29  ;;  %v134_v32 = vmax.f32 %v126_v28, %v133_v30 }
 0x185   :  { %v131_v33 = vrot.slane %v130_v31, 1  ;;  %v135_v34 = vrot.slane %v134_v32, 2 }
 0x187   :  { %v132_v35 = vmax.f32 %v130_v31, %v131_v33  ;;  %v136_v36 = vmax.f32 %v134_v32, %v135_v34 }
 0x189   :  { %v139_v38 = vsub.f32 %v123_v25, %v132_v35  ;;  %v137_v39 = vrot.slane %v136_v36, 1 }
 0x18b   :  { %v141_v41 = vmul.f32 1.442695, %v139_v38  ;;  %v138_v42 = vmax.f32 %v136_v36, %v137_v39 }
 0x18d   :  { %346 = vpow2.f32 %v141_v41  ;;  %v140_v43 = vsub.f32 %v126_v28, %v138_v42 }
 0x18f   :  { %v143_v46 = vmul.f32 1.442695, %v140_v43 }
 0x191   :  { %348 = vpow2.f32 %v143_v46 }
 0x192   :  { %350 = vpow2.f32 %v287_v45 }
 0x193   :  { %352 = vpow2.f32 %v288_v47 }
 0x197   :  { %v347_v48 = vpop.eup %346 }
 0x198   :  { %v145_v49 = vrot.slane %v347_v48, 4 }
 0x19a   :  { %v146_v50 = vadd.f32 %v347_v48, %v145_v49 }
 0x19b   :  { %v349_v51 = vpop.eup %348 }
 0x19c   :  { %v351_v52 = vpop.eup %350  ;;  %v151_v53 = vrot.slane %v349_v51, 4  ;;  %v147_v54 = vrot.slane %v146_v50, 2 }
 0x19d   :  { %v253_v57 = vadd.f32 1.0, %v351_v52  ;;  %v353_v58 = vpop.eup %352 }
 0x19e   :  { %v152_v55 = vadd.f32 %v349_v51, %v151_v53  ;;  %v148_v56 = vadd.f32 %v147_v54, %v146_v50  ;;  %v254_v63 = vadd.f32 1.0, %v353_v58 }
 0x19f   :  { %354 = vrcp.f32 %v253_v57 }
 0x1a0   :  { %v153_v59 = vrot.slane %v152_v55, 2  ;;  %v149_v60 = vrot.slane %v148_v56, 1 }
 0x1a2   :  { %v150_v61 = vadd.f32 %v149_v60, %v148_v56  ;;  %v154_v62 = vadd.f32 %v153_v59, %v152_v55 }
 0x1a4   :  { %v155_v0 = vrot.slane %v154_v62, 1  ;;  %356 = vrcp.f32 %v150_v61 }
 0x1a5   :  { %358 = vrcp.f32 %v254_v63 }
 0x1a6   :  { %v156_v1 = vadd.f32 %v155_v0, %v154_v62 }
 0x1a8   :  { %360 = vrcp.f32 %v156_v1 }
 0x1a9   :  { %v355_v2 = vpop.eup %354 }
 0x1ae   :  { %v357_v3 = vpop.eup %356 }
 0x1af   :  { %v158_v4 = vmul.f32 %v357_v3, %v347_v48  ;;  %v359_v6 = vpop.eup %358 }
 0x1b1   :  { %v259_v7 = vmul.f32 %v355_v2, %v158_v4 }
 0x1b2   :  { %v361_v8 = vpop.eup %360 }
 0x1b3   :  { %v160_v9 = vmul.f32 %v361_v8, %v349_v51  ;;  %v261_v10 = vmul.f32 %v259_v7, %v434_v5 }
 0x1b5   :  { %v260_v11 = vmul.f32 %v359_v6, %v160_v9  ;;  %263 = vst.msk [vmem:[#allocation2] sm:$0xff] %vm27_vm0, %v261_v10 }
 0x1b7   :  { %v262_v12 = vmul.f32 %v260_v11, %v455_v13 }
 0x1b9   :  { %264 = vst.msk [vmem:[#allocation2 + $0x8] sm:$0xff] %vm27_vm0, %v262_v12 }
 0x1ba   :  { %373 = shalt.err (!%p370_p4)
}
 0x1bb   :  { %s374_s17 = scalar_lea.hbm %s488_s5, 256 }
 0x1bc   :  { %p375_p5 = scmp.ne.s32.totalorder %s488_s5, %s374_s17  ;;  %p378_p6 = scmp.lt.u32.totalorder %s374_s17, %s488_s5 }
 0x1be   :  { %p380_p7 = pnand %p378_p6, %p375_p5 }
 0x1c0   :  { %383 = shalt.err (!%p380_p7)
}
 0x1c1   :  { %s387_s22 = smov 128   ;;  %s388_s23 = smov 8  }
 0x1c2   :  { %276 = dma.vmem_to_hbm [thread:$0]  %s271_s13, 256, %s488_s5, [#allocation3], %s387_s22, %s387_s22, %s388_s23  }
 0x1c3   :  { %384 = dma.done.wait [#allocation3], 256  }
 0x1c4   :  { %385 = vsyncadd [#allocation3], 4294967040 }
 0x1c5   :  { %280 = vsyncpa [#allocation3], 1 }

</bundles_post_ra>
